<compile_context>
chip_gen: v5e
topology: v5e:2x2
jax: 0.10.0
libtpu: 0.0.40
codegen_flags: <defaults>
</compile_context>

<pallas_src>
import jax
import jax.numpy as jnp
from jax import lax
from jax.experimental import pallas as pl
from jax.experimental.pallas import tpu as pltpu


# ~2 MiB (f32) per input block; with the output block and double buffering the
# per-step VMEM footprint stays < ~10 MiB on every TPU generation.
_VMEM_BLOCK_ELEMS = 512 * 1024


def _largest_divisor_leq(n, cap):
    cap = max(1, min(n, cap))
    for d in range(cap, 0, -1):
        if n % d == 0:
            return d
    return 1


def _choose_tiles(N, H, W):
    """Pick (batch_tile, row_tile) so blocks fit VMEM and the grid has >=2 steps."""
    # Row tile: multiple of 8 (sublane tiling) dividing H, as large as fits the
    # per-block budget; small planes keep the whole plane per block.
    if H * W <= _VMEM_BLOCK_ELEMS or H <= 8:
        th = H
    else:
        th = None
        cap_rows = max(8, _VMEM_BLOCK_ELEMS // max(W, 1))
        cand = (min(H, cap_rows) // 8) * 8
        while cand >= 8:
            if H % cand == 0:
                th = cand
                break
            cand -= 8
        if th is None:
            th = H  # no aligned divisor fits; fall back to whole plane
    # Batch tile: pack planes per grid step (amortize ~0.35us/step overhead),
    # but keep at least 2 grid steps when possible so both v7x TCs get work.
    cap_b = max(1, _VMEM_BLOCK_ELEMS // max(th * W, 1))
    bt = _largest_divisor_leq(N, cap_b)
    while bt > 1 and (N // bt) * (H // th) < 2:
        bt = _largest_divisor_leq(N, bt - 1)
    return bt, th


def _sobelxy_kernel(x_ref, halo_ref, o_ref):
    # x_ref   : (Bt, Th, W)    row-tile of Bt planes
    # halo_ref: (Bt, 1, 2, W)  [row just above tile, row just below tile],
    #                          already zeroed at the image border (= conv padding)
    # o_ref   : (Bt, Th, W)
    bt, th, w = x_ref.shape
    x = x_ref[...].astype(jnp.float32)
    halo = halo_ref[...].astype(jnp.float32)
    up_row = halo[:, :, 0, :]          # (Bt, 1, W)  x[i-1] for the first tile row
    dn_row = halo[:, :, 1, :]          # (Bt, 1, W)  x[i+1] for the last tile row

    # Vertical neighbours (halo rows supply the cross-tile / zero-padding rows).
    if th > 1:
        x_up = jnp.concatenate([up_row, x[:, :th - 1, :]], axis=1)   # x[i-1, j]
        x_dn = jnp.concatenate([x[:, 1:, :], dn_row], axis=1)        # x[i+1, j]
    else:
        x_up, x_dn = up_row, dn_row

    # Separable Sobel.
    s = x_up + 2.0 * x + x_dn          # column smooth  (feeds sobel-x)
    d = x_up - x_dn                    # column difference (feeds sobel-y)

    # Horizontal neighbours with zero padding at the image border.
    if w > 1:
        zcol = jnp.zeros((bt, th, 1), jnp.float32)
        s_l = jnp.concatenate([zcol, s[:, :, :w - 1]], axis=2)       # s[i, j-1]
        s_r = jnp.concatenate([s[:, :, 1:], zcol], axis=2)           # s[i, j+1]
        d_l = jnp.concatenate([zcol, d[:, :, :w - 1]], axis=2)       # d[i, j-1]
        d_r = jnp.concatenate([d[:, :, 1:], zcol], axis=2)           # d[i, j+1]
    else:
        s_l = s_r = jnp.zeros_like(s)
        d_l = d_r = jnp.zeros_like(d)

    gx = s_r - s_l                     # cross-corr with [[-1,0,1],[-2,0,2],[-1,0,1]]
    gy = d_l + 2.0 * d + d_r           # cross-corr with [[1,2,1],[0,0,0],[-1,-2,-1]]
    o_ref[...] = (jnp.abs(gx) + jnp.abs(gy)).astype(o_ref.dtype)


def sobelxy(x, *, row_tile=None, batch_tile=None):
    """x: (N, 1, H, W) float32 -> (N, 1, H, W), |Sobel_x(x)| + |Sobel_y(x)|."""
    N, C, H, W = x.shape
    assert C == 1, "Sobelxy weight is (1,1,3,3): input must have 1 channel"
    xf = x.reshape(N, H, W)

    bt, th = _choose_tiles(N, H, W)
    if row_tile is not None:
        assert H % row_tile == 0 and (row_tile == H or row_tile % 8 == 0)
        th = row_tile
    if batch_tile is not None:
        assert N % batch_tile == 0
        bt = batch_tile
    nb, nr = N // bt, H // th

    # Rows just above / below every row-tile, pre-zeroed at the image border.
    # This is the only data outside its own tile the 3x3 stencil needs, so the
    # kernel never reads a pre-padded copy of the full input.
    zrow = jnp.zeros((N, 1, W), x.dtype)
    if nr > 1:
        up = jnp.concatenate([zrow, xf[:, th - 1:H - 1:th, :]], axis=1)  # (N, nr, W)
        dn = jnp.concatenate([xf[:, th::th, :], zrow], axis=1)           # (N, nr, W)
    else:
        up, dn = zrow, zrow
    halo = jnp.stack([up, dn], axis=2)                                   # (N, nr, 2, W)

    out = pl.pallas_call(
        _sobelxy_kernel,
        out_shape=jax.ShapeDtypeStruct((N, H, W), x.dtype),
        grid_spec=pltpu.PrefetchScalarGridSpec(
            num_scalar_prefetch=0,
            grid=(nb, nr),
            in_specs=[
                pl.BlockSpec((bt, th, W), lambda b, j: (b, j, 0)),
                pl.BlockSpec((bt, 1, 2, W), lambda b, j: (b, j, 0, 0)),
            ],
            out_specs=pl.BlockSpec((bt, th, W), lambda b, j: (b, j, 0)),
        ),
        compiler_params=pltpu.CompilerParams(
            dimension_semantics=("parallel", "parallel"),
            vmem_limit_bytes=32 * 1024 * 1024,
        ),
    )(xf, halo)
    return out.reshape(N, C, H, W)


def _reference(x):
    # pure-JAX reference of the PyTorch forward (cross-correlation, padding=1)
    kx = jnp.array([[-1., 0., 1.], [-2., 0., 2.], [-1., 0., 1.]],
                   dtype=jnp.float32).reshape(1, 1, 3, 3)
    ky = jnp.array([[1., 2., 1.], [0., 0., 0.], [-1., -2., -1.]],
                   dtype=jnp.float32).reshape(1, 1, 3, 3)
    dn = lax.conv_dimension_numbers(x.shape, kx.shape, ("NCHW", "OIHW", "NCHW"))
    gx = lax.conv_general_dilated(x, kx, (1, 1), ((1, 1), (1, 1)),
                                  dimension_numbers=dn)
    gy = lax.conv_general_dilated(x, ky, (1, 1), ((1, 1), (1, 1)),
                                  dimension_numbers=dn)
    return jnp.abs(gx) + jnp.abs(gy)


if __name__ == "__main__":
    key = jax.random.PRNGKey(0)

    # Case 1: small planes -> whole-plane tiles, one plane per grid step.
    x1 = jax.random.normal(key, (2, 1, 16, 16), dtype=jnp.float32)
    out1 = jax.block_until_ready(sobelxy(x1))
    ref1 = jax.block_until_ready(_reference(x1))
    assert out1.shape == x1.shape
    assert jnp.allclose(out1, ref1, atol=1e-5, rtol=1e-5)

    # Case 2: force the row-tiling + halo path and plane batching at small size.
    key2 = jax.random.PRNGKey(1)
    x2 = jax.random.normal(key2, (2, 1, 32, 16), dtype=jnp.float32)
    out2 = jax.block_until_ready(sobelxy(x2, row_tile=8, batch_tile=2))
    ref2 = jax.block_until_ready(_reference(x2))
    assert out2.shape == x2.shape
    assert jnp.allclose(out2, ref2, atol=1e-5, rtol=1e-5)

    print("KERNEL_OK")
</pallas_src>

<mosaic_0001>
module attributes {stable_mosaic.version = 11 : i64} {
  func.func @_sobelxy_kernel(%arg0: i32, %arg1: i32, %arg2: memref<1x16x16xf32, #tpu.memory_space<vmem>>, %arg3: memref<1x1x2x16xf32, #tpu.memory_space<vmem>>, %arg4: memref<1x16x16xf32, #tpu.memory_space<vmem>>) attributes {dimension_semantics = [#tpu.dimension_semantics<parallel>, #tpu.dimension_semantics<parallel>], iteration_bounds = array<i64: 2, 1>, scalar_prefetch = 0 : i64, scratch_operands = 0 : i64, tpu.core_type = #tpu.core_type<tc>, window_params = [{transform_indices = @transform_0, window_bounds = array<i64: 1, 16, 16>}, {transform_indices = @transform_1, window_bounds = array<i64: 1, 1, 2, 16>}, {transform_indices = @transform_2, window_bounds = array<i64: 1, 16, 16>}]} {
    %c0 = arith.constant 0 : index
    %c0_0 = arith.constant 0 : index
    %c0_1 = arith.constant 0 : index
    %0 = vector.load %arg2[%c0, %c0_0, %c0_1] : memref<1x16x16xf32, #tpu.memory_space<vmem>>, vector<1x16x16xf32>
    %c0_2 = arith.constant 0 : index
    %c0_3 = arith.constant 0 : index
    %c0_4 = arith.constant 0 : index
    %c0_5 = arith.constant 0 : index
    %1 = vector.load %arg3[%c0_2, %c0_3, %c0_4, %c0_5] : memref<1x1x2x16xf32, #tpu.memory_space<vmem>>, vector<1x1x2x16xf32>
    %2 = vector.extract_strided_slice %1 {offsets = [0, 0, 0, 0], sizes = [1, 1, 1, 16], strides = [1, 1, 1, 1]} : vector<1x1x2x16xf32> to vector<1x1x1x16xf32>
    %3 = vector.shape_cast %2 : vector<1x1x1x16xf32> to vector<1x1x16xf32>
    %4 = vector.extract_strided_slice %1 {offsets = [0, 0, 1, 0], sizes = [1, 1, 1, 16], strides = [1, 1, 1, 1]} : vector<1x1x2x16xf32> to vector<1x1x1x16xf32>
    %5 = vector.shape_cast %4 : vector<1x1x1x16xf32> to vector<1x1x16xf32>
    %6 = vector.extract_strided_slice %0 {offsets = [0, 0, 0], sizes = [1, 15, 16], strides = [1, 1, 1]} : vector<1x16x16xf32> to vector<1x15x16xf32>
    %7 = tpu.concatenate %3, %6 in 1 : vector<1x1x16xf32>, vector<1x15x16xf32> -> vector<1x16x16xf32>
    %8 = vector.extract_strided_slice %0 {offsets = [0, 1, 0], sizes = [1, 15, 16], strides = [1, 1, 1]} : vector<1x16x16xf32> to vector<1x15x16xf32>
    %9 = tpu.concatenate %8, %5 in 1 : vector<1x15x16xf32>, vector<1x1x16xf32> -> vector<1x16x16xf32>
    %cst = arith.constant 2.000000e+00 : f32
    %10 = vector.broadcast %cst : f32 to vector<1x16x16xf32>
    %11 = arith.mulf %10, %0 : vector<1x16x16xf32>
    %12 = arith.addf %7, %11 : vector<1x16x16xf32>
    %13 = arith.addf %12, %9 : vector<1x16x16xf32>
    %14 = arith.subf %7, %9 : vector<1x16x16xf32>
    %cst_6 = arith.constant 0.000000e+00 : f32
    %15 = vector.broadcast %cst_6 : f32 to vector<1x16x1xf32>
    %16 = vector.extract_strided_slice %13 {offsets = [0, 0, 0], sizes = [1, 16, 15], strides = [1, 1, 1]} : vector<1x16x16xf32> to vector<1x16x15xf32>
    %17 = tpu.concatenate %15, %16 in 2 : vector<1x16x1xf32>, vector<1x16x15xf32> -> vector<1x16x16xf32>
    %18 = vector.extract_strided_slice %13 {offsets = [0, 0, 1], sizes = [1, 16, 15], strides = [1, 1, 1]} : vector<1x16x16xf32> to vector<1x16x15xf32>
    %19 = tpu.concatenate %18, %15 in 2 : vector<1x16x15xf32>, vector<1x16x1xf32> -> vector<1x16x16xf32>
    %20 = vector.extract_strided_slice %14 {offsets = [0, 0, 0], sizes = [1, 16, 15], strides = [1, 1, 1]} : vector<1x16x16xf32> to vector<1x16x15xf32>
    %21 = tpu.concatenate %15, %20 in 2 : vector<1x16x1xf32>, vector<1x16x15xf32> -> vector<1x16x16xf32>
    %22 = vector.extract_strided_slice %14 {offsets = [0, 0, 1], sizes = [1, 16, 15], strides = [1, 1, 1]} : vector<1x16x16xf32> to vector<1x16x15xf32>
    %23 = tpu.concatenate %22, %15 in 2 : vector<1x16x15xf32>, vector<1x16x1xf32> -> vector<1x16x16xf32>
    %24 = arith.subf %19, %17 : vector<1x16x16xf32>
    %cst_7 = arith.constant 2.000000e+00 : f32
    %25 = vector.broadcast %cst_7 : f32 to vector<1x16x16xf32>
    %26 = arith.mulf %25, %14 : vector<1x16x16xf32>
    %27 = arith.addf %21, %26 : vector<1x16x16xf32>
    %28 = arith.addf %27, %23 : vector<1x16x16xf32>
    %29 = math.absf %24 : vector<1x16x16xf32>
    %30 = math.absf %28 : vector<1x16x16xf32>
    %31 = arith.addf %29, %30 : vector<1x16x16xf32>
    %c0_8 = arith.constant 0 : index
    %c0_9 = arith.constant 0 : index
    %c0_10 = arith.constant 0 : index
    %32 = vector.load %arg4[%c0_8, %c0_9, %c0_10] : memref<1x16x16xf32, #tpu.memory_space<vmem>>, vector<1x16x16xf32>
    tpu.vector_store %arg4[%c0_8, %c0_9, %c0_10], %31 {strides = array<i32>} : memref<1x16x16xf32, #tpu.memory_space<vmem>>, vector<1x16x16xf32>,
    return
  }
  func.func @transform_0(%arg0: i32, %arg1: i32) -> (i32, i32, i32) {
    %c0_i32 = arith.constant 0 : i32
    %c0_i32_0 = arith.constant 0 : i32
    return %arg0, %arg1, %c0_i32 : i32, i32, i32
  }
  func.func @transform_1(%arg0: i32, %arg1: i32) -> (i32, i32, i32, i32) {
    %c0_i32 = arith.constant 0 : i32
    %c0_i32_0 = arith.constant 0 : i32
    %c0_i32_1 = arith.constant 0 : i32
    return %arg0, %arg1, %c0_i32, %c0_i32_0 : i32, i32, i32, i32
  }
  func.func @transform_2(%arg0: i32, %arg1: i32) -> (i32, i32, i32) {
    %c0_i32 = arith.constant 0 : i32
    %c0_i32_0 = arith.constant 0 : i32
    return %arg0, %arg1, %c0_i32 : i32, i32, i32
  }
}

</mosaic_0001>

<bundles_post_ra>
// kernel: tpu_custom_call.1
= control target key start
LH: loop header
LB: loop body
LE: loop exit
PB: predicated region body
PF: predicated region fallthrough
CT: control target
= control target key end

     0   :  { %7 = vsyncpa [#allocation3], 0  ;;  %s850_s0 = inlined_call_operand.hbm [shape: f32[2,16,16], index: 0, kind: input, shape index: {}]   ;;  %s851_s1 = inlined_call_operand.hbm [shape: f32[2,1,2,16], index: 1, kind: input, shape index: {}]   ;;  %s852_s2 = inlined_call_operand.hbm [shape: f32[2,16,16], index: 2, kind: output, shape index: {}]  }
   0x1   :  { %9 = vsyncpa [#allocation3 + $0x1], 0 }
   0x2   :  { %10 = vsyncpa [#allocation6], 0 }
   0x3   :  { %12 = vsyncpa [#allocation6 + $0x1], 0 }
   0x4   :  { %13 = vsyncpa [#allocation4], 0 }
   0x5   :  { %15 = vsyncpa [#allocation4 + $0x1], 0  ;;  %s702_s9 = smov 0   ;;  %s704_s10 = smov 0  }
   0x6   :  { %s706_s11 = smov 0   ;;  %s708_s12 = smov 0  }
   0x7   :  { %s710_s13 = smov 0   ;;  %s712_s14 = smov 0  }
   0x8 LB: > { %s440_s15 = sadd.s32 4294967295, %s679_s14   ;;  %s441_s16 = sadd.s32 4294967294, %s679_s14   ;;  %s679_s14 = sphi %s712_s14, %s21_s14   ;;  %s675_s13 = sphi %s710_s13, %s862_s13   ;;  %s671_s12 = sphi %s708_s12, %s861_s12   ;;  %s667_s11 = sphi %s706_s11, %s860_s11   ;;  %s663_s10 = sphi %s704_s10, %s859_s10   ;;  %s659_s9 = sphi %s702_s9, %s858_s9  }
   0x9   : > { %s33_s17 = sadd.s32 1, %s675_s13  ;;  %s42_s18 = sadd.s32 1, %s667_s11 }
   0xa   : > { %p35_p0 = scmp.ge.s32.totalorder %s33_s17, 2  ;;  %p49_p1 = scmp.ne.s32.totalorder %s667_s11, %s663_s10 }
   0xb   : > { %p50_p2 = scmp.eq.s32.totalorder %s679_s14, 0  ;;  %p55_p3 = scmp.ne.s32.totalorder %s663_s10, %s659_s9 }
   0xc   : > { %s864_s17 = smov (%p35_p0, %s33_s17), 0  ;;  %p56_p5 = scmp.eq.s32.totalorder %s440_s15, 0 }
   0xd   : > { %p743_p4 = por %p50_p2, %p49_p1  ;;  %s37_s20 = ssub.s32 %s675_s13, %s864_s17 }
   0xe   : > { %p109_p6 = scmp.eq.s32.totalorder %s440_s15, 1  ;;  %p40_p7 = scmp.eq.s32.totalorder %s37_s20, 0 }
   0xf   : > { %p749_p8 = por %p56_p5, %p55_p3  ;;  %p115_p10 = scmp.eq.s32.totalorder %s441_s16, 1 }
  0x10   : > { %p753_p9 = por %p109_p6, %p49_p1  ;;  %p443_p12 = scmp.ge.s32.totalorder %s679_s14, 2 }
  0x11   : > { %s758_s23 = scalar_select %p40_p7, %s667_s11, %s42_s18  }
  0x12   : > { %p760_p11 = por %p115_p10, %p55_p3  ;;  %p477_p13 = scmp.lt.s32.totalorder %s679_s14, 2 }
  0x13   : > { %s135_s25 = sand.u32 1, %s667_s11   ;;  %s458_s27 = sshll.u32 %s675_s13, 4 }
  0x14   : > { %s444_s26 = sshll.u32 %s135_s25, 4  ;;  %s146_s30 = scalar_lea.hbm %s850_s0, %s458_s27 }
  0x15   : > { %s139_s3 = scalar_lea.vmem [#allocation2], %s444_s26  ;;  %s147_s5 = sshll.u32 %s146_s30, 4  ;;  %s148_s5 = int_to_ptr.hbm [resolvable:$true] %s147_s5 }
  0x16   : > { %s149_s4 = sshll.u32 %s139_s3, 4  ;;  %p773_p0 = pnand %p477_p13, %p743_p4  ;;  %s150_s4 = int_to_ptr.vmem [resolvable:$true] %s149_s4 }
  0x17   : > { %p449_p1 = scmp.ge.s32.totalorder %s679_s14, 1  ;;  %s136_s7 = scalar_lea.sflag [#allocation3], %s135_s25 }
  0x18   : > { %s681_s8 = smov 128   ;;  %s682_s15 = smov 8  }
  0x19   : > { %469 = dma.hbm_to_vmem [thread:$0]  (!%p773_p0), %s148_s5, 256, %s150_s4, %s136_s7, %s681_s8, %s681_s8, %s682_s15  }
  0x1a   : > { %p177_p2 = scmp.lt.s32.totalorder %s679_s14, 3  ;;  %s447_s16 = sshll.u32 %s135_s25, 1 }
  0x1b   : > { %s448_s18 = sshll.u32 %s675_s13, 1  ;;  %s163_s27 = scalar_lea.vmem [#allocation5], %s447_s16 }
  0x1c   : > { %p178_p3 = pnand %p449_p1, %p177_p2  ;;  %s168_s19 = scalar_lea.hbm %s851_s1, %s448_s18 }
  0x1d   : > { %s172_s28 = sshll.u32 %s163_s27, 4  ;;  %s170_s29 = sshll.u32 %s168_s19, 4  ;;  %s173_s28 = int_to_ptr.vmem [resolvable:$true] %s172_s28  ;;  %s171_s29 = int_to_ptr.hbm [resolvable:$true] %s170_s29 }
  0x1e   : > { %s160_s30 = scalar_lea.sflag [#allocation6], %s135_s25  ;;  %181 = sbr.rel (%p178_p3) target bundleno = 189 (0xbd), region = 28 }
  0x1f   : > { %472 = dma.hbm_to_vmem [thread:$0]  (!%p773_p0), %s171_s29, 32, %s173_s28, %s160_s30  }
  0x20   : > { %s788_s3 = sand.u32 (!%p178_p3), 1, %s663_s10  }
  0x21   : > { %s450_s4 = sshll.u32 (!%p178_p3), %s788_s3, 4  ;;  %s184_s5 = scalar_lea.sflag (!%p178_p3), [#allocation3], %s788_s3 }
  0x22   : > { %s187_s7 = scalar_lea.vmem (!%p178_p3), [#allocation2], %s450_s4 }
  0x23   : > { %646 = dma.done.wait (%p749_p8), %s184_s5, 256  }
  0x24   : > { %648 = vsyncadd (%p749_p8), %s184_s5, 4294967040  ;;  %s451_s25 = sshll.u32 %s788_s3, 1  ;;  %s194_s6 = scalar_lea.sflag [#allocation6], %s788_s3 }
  0x25   : > { %s197_s8 = scalar_lea.vmem [#allocation5], %s451_s25 }
  0x26   : > { %650 = dma.done.wait (%p749_p8), %s194_s6, 32  }
  0x27   : > { %652 = vsyncadd (%p749_p8), %s194_s6, 4294967264  ;;  %v226_v0 = vld [vmem:[%s187_s7] sm:$0xff]  ;;  %v227_v1 = vld [vmem:[%s187_s7 + $0x8] sm:$0xff]  ;;  %vm231_vm0 = vcmask 1040384   ;;  %vm238_vm1 = vcmask 1046528   ;;  %s683_s21 = smov 1  }
  0x28   : > { %v228_v2 = vld [vmem:[%s197_s8] sm:$0x3]  ;;  %v232_v3 = vrot.slane %v226_v0, 7  ;;  %v239_v4 = vrot.slane %v226_v0, 1  ;;  %v240_v5 = vrot.slane %v227_v1, 1  ;;  %v248_v6 = vmul.f32 2.0, %v226_v0 }
  0x29   : > { %v233_v7 = vrot.slane %v227_v1, 7  ;;  %v245_v10 = vrot.slane %v228_v2, 2  ;;  %v249_v13 = vmul.f32 2.0, %v227_v1  ;;  %s684_s15 = smov 127   ;;  %vm264_vm2 = vcmask 7168   ;;  %s459_s16 = sshll.u32 %s671_s12, 4 }
  0x2a   : > { %v237_v8 = vsel %vm231_vm0, %v228_v2, %v232_v3  ;;  %v241_v9 = vsel %vm238_vm1, %v239_v4, %v240_v5  ;;  %vm273_vm3 = vcmask 121856   ;;  %s325_s26 = scalar_lea.hbm %s852_s2, %s459_s16  ;;  %s223_s12 = scalar_lea.vmem [#allocation7], %s450_s4  ;;  %vm308_vm4 = vcmask 130048  }
  0x2b   : > { %v254_v11 = vsub.f32 %v237_v8, %v241_v9  ;;  %v250_v12 = vadd.f32 %v248_v6, %v237_v8  ;;  %v234_v14 = vsel %vm231_vm0, %v232_v3, %v233_v7  ;;  %v247_v16 = vsel %vm238_vm1, %v240_v5, %v245_v10  ;;  %s326_s19 = sshll.u32 %s223_s12, 4  ;;  %s328_s27 = sshll.u32 %s325_s26, 4  ;;  %s327_s19 = int_to_ptr.vmem [resolvable:$true] %s326_s19  ;;  %s329_s27 = int_to_ptr.hbm [resolvable:$true] %s328_s27 }
  0x2c   : > { %v251_v17 = vadd.f32 %v249_v13, %v234_v14  ;;  %v255_v18 = vsub.f32 %v234_v14, %v247_v16  ;;  %s312_s28 = scalar_lea.sflag [#allocation4], %s788_s3  ;;  %s607_s29 = sshra.s32 %s329_s27, 4  ;;  %s608_s29 = int_to_ptr.hbm [resolvable:$true] %s607_s29 }
  0x2d   : > { %278 = vrot.lane.b32.xlu0 %v254_v11, %s683_s21  ;;  %v252_v15 = vadd.f32 %v250_v12, %v241_v9  ;;  %v296_v25 = vmul.f32 2.0, %v254_v11  ;;  %s609_s30 = scalar_lea.hbm %s608_s29, 16  ;;  %s613_s7 = scalar_lea.hbm %s852_s2, 32 }
  0x2e   : > { %v253_v19 = vadd.f32 %v251_v17, %v247_v16  ;;  %v297_v30 = vmul.f32 2.0, %v255_v18  ;;  %p610_p4 = scmp.ne.s32.totalorder %s608_s29, %s609_s30  ;;  %p614_p7 = scmp.lt.s32.totalorder %s608_s29, %s852_s2 }
  0x2f   : > { %258 = vrot.lane.b32.xlu1 %v252_v15, %s683_s21  ;;  %267 = vrot.lane.b32.xlu2 %v252_v15, %s684_s15  ;;  %p615_p8 = scmp.lt.s32.totalorder %s613_s7, %s609_s30 }
  0x30   : > { %p611_p5 = pnand %p610_p4, %p753_p9 }
  0x31   : > { %p616_p10 = por %p615_p8, %p614_p7 }
  0x32   : > { %p612_p6 = pneg %p611_p5 }
  0x34   : > { %p617_p13 = pnand %p616_p10, %p612_p6 }
  0x35   : > { %280 = vrot.lane.b32.xlu0 %v255_v18, %s683_s21 }
  0x37   : > { %260 = vrot.lane.b32.xlu1 %v253_v19, %s683_s21  ;;  %269 = vrot.lane.b32.xlu2 %v253_v19, %s684_s15 }
  0x3d   : > { %286 = vrot.lane.b32.xlu0 %v254_v11, %s684_s15 }
  0x3f   : > { %288 = vrot.lane.b32.xlu1 %v255_v18, %s684_s15 }
  0x89   : > { %v268_v21 = vpop.permute.xlu2 %267 }
  0x8a   : > { %v274_v28 = vsel %vm273_vm3, %v268_v21, 0.0 }
  0x91   : > { %v270_v26 = vpop.permute.xlu2 %269 }
  0x92   : > { %v275_v32 = vsel %vm273_vm3, %v270_v26, 0.0 }
  0x9f   : > { %v279_v20 = vpop.permute.xlu0 %278 }
  0xa0   : > { %v284_v27 = vsel %vm264_vm2, 0.0, %v279_v20 }
  0xa1   : > { %v259_v22 = vpop.permute.xlu1 %258  ;;  %v298_v34 = vadd.f32 %v296_v25, %v284_v27 }
  0xa2   : > { %v265_v29 = vsel %vm264_vm2, 0.0, %v259_v22 }
  0xa3   : > { %v294_v35 = vsub.f32 %v274_v28, %v265_v29 }
  0xa5   : > { %v302_v43 = vand.u32 2147483647, %v294_v35 }
  0xa7   : > { %v281_v23 = vpop.permute.xlu0 %280 }
  0xa8   : > { %v285_v31 = vsel %vm264_vm2, 0.0, %v281_v23 }
  0xa9   : > { %v261_v24 = vpop.permute.xlu1 %260  ;;  %v299_v38 = vadd.f32 %v297_v30, %v285_v31 }
  0xaa   : > { %v266_v33 = vsel %vm264_vm2, 0.0, %v261_v24 }
  0xab   : > { %v295_v39 = vsub.f32 %v275_v32, %v266_v33 }
  0xad   : > { %v303_v46 = vand.u32 2147483647, %v295_v39 }
  0xaf   : > { %v287_v36 = vpop.permute.xlu0 %286 }
  0xb0   : > { %v292_v37 = vsel %vm273_vm3, %v287_v36, 0.0 }
  0xb1   : > { %v300_v40 = vadd.f32 %v298_v34, %v292_v37  ;;  %v289_v41 = vpop.permute.xlu1 %288 }
  0xb2   : > { %v293_v42 = vsel %vm273_vm3, %v289_v41, 0.0 }
  0xb3   : > { %v304_v44 = vand.u32 2147483647, %v300_v40  ;;  %v301_v45 = vadd.f32 %v299_v38, %v293_v42 }
  0xb5   : > { %v306_v47 = vadd.f32 %v304_v44, %v302_v43  ;;  %v305_v48 = vand.u32 2147483647, %v301_v45 }
  0xb7   : > { %309 = vst.msk [vmem:[%s223_s12] sm:$0xff] %vm308_vm4, %v306_v47  ;;  %v307_v49 = vadd.f32 %v305_v48, %v303_v46 }
  0xb9   : > { %310 = vst.msk [vmem:[%s223_s12 + $0x8] sm:$0xff] %vm308_vm4, %v307_v49 }
  0xba   : > { %620 = shalt.err (!%p617_p13)
}
  0xbb   : > { %s685_s3 = smov 128   ;;  %s686_s8 = smov 8  }
  0xbc   : > { %464 = dma.vmem_to_hbm [thread:$0]  (%p753_p9), %s327_s19, 256, %s329_s27, %s312_s28, %s685_s3, %s685_s3, %s686_s8  }
  0xbd PF: > { %s343_s21 = sand.u32 1, %s659_s9   ;;  %p474_p0 = pnand %p443_p12, %p760_p11 }
  0xbe   : > { %s344_s15 = scalar_lea.sflag [#allocation4], %s343_s21 }
  0xbf   : > { %p475_p1 = pneg %p474_p0 }
  0xc1   : > { %654 = dma.done.wait (%p475_p1), %s344_s15, 256  }
  0xc2   : > { %656 = vsyncadd (%p475_p1), %s344_s15, 4294967040  ;;  %s21_s14 = sadd.s32 1, %s679_s14   ;;  %s858_s9 = smov %s663_s10 }
  0xc3   : > { %p18_p2 = scmp.ge.s32.totalorder %s21_s14, 4   ;;  %s859_s10 = smov %s667_s11 }
  0xc4   : > { %s860_s11 = smov %s758_s23  ;;  %s861_s12 = smov %s675_s13 }
  0xc5   : > { %s862_s13 = smov %s864_s17  ;;  %20 = sbr.rel (!%p18_p2) target bundleno = 8 (0x8), region = 86 }
  0xca   :  { %350 = vsyncpa [#allocation3], 1 }
  0xcb   :  { %352 = vsyncpa [#allocation3 + $0x1], 1 }
  0xcc   :  { %353 = vsyncpa [#allocation6], 1 }
  0xcd   :  { %355 = vsyncpa [#allocation6 + $0x1], 1 }
  0xce   :  { %356 = vsyncpa [#allocation4], 1 }
  0xcf   :  { %358 = vsyncpa [#allocation4 + $0x1], 1 }

</bundles_post_ra>
